<compile_context>
chip_gen: v5e
topology: v5e:2x2
jax: 0.10.0
libtpu: 0.0.40
codegen_flags: <defaults>
</compile_context>

<pallas_src>
import functools

import jax
import jax.numpy as jnp
from jax.experimental import pallas as pl
from jax.experimental.pallas import tpu as pltpu


def _leaky_relu(x, slope=0.2):
    return jnp.where(x > 0, x, slope * x)


def _round_up(x, m):
    return ((x + m - 1) // m) * m


def thrupling_kernel(masks_ref, z_ref,
                     mw1, mb1, mw2, mb2, mw3, mb3,
                     lw1, lb1, lw2, lb2, lw3, lb3,
                     out_ref):
    z = z_ref[...].astype(jnp.float32)                    # (TB, Dp) f32
    mask_a = masks_ref[0:1, :]                            # m0
    mask_ab = masks_ref[1:2, :]                           # m0 + m1
    mask_sum = masks_ref[2:3, :]                          # m0 + m1 + m2

    # MLP inputs (f32 elementwise, bf16 only on the MXU operand path).
    m_in = (mask_a * z).astype(jnp.bfloat16)
    l_in = (mask_ab * z).astype(jnp.bfloat16)

    # Layer 1 (interleave the two independent chains to keep MXU pushes dense).
    h_m = jnp.dot(m_in, mw1[...], preferred_element_type=jnp.float32) + mb1[...]
    h_l = jnp.dot(l_in, lw1[...], preferred_element_type=jnp.float32) + lb1[...]
    h_m = _leaky_relu(h_m).astype(jnp.bfloat16)
    h_l = _leaky_relu(h_l).astype(jnp.bfloat16)

    # Layer 2.
    h_m = jnp.dot(h_m, mw2[...], preferred_element_type=jnp.float32) + mb2[...]
    h_l = jnp.dot(h_l, lw2[...], preferred_element_type=jnp.float32) + lb2[...]
    h_m = _leaky_relu(h_m).astype(jnp.bfloat16)
    h_l = _leaky_relu(h_l).astype(jnp.bfloat16)

    # Layer 3 (output masks m1 / m2 already folded into W3 / b3 in the wrapper).
    m_out = jnp.dot(h_m, mw3[...], preferred_element_type=jnp.float32) + mb3[...]
    l_out = jnp.dot(h_l, lw3[...], preferred_element_type=jnp.float32) + lb3[...]

    out_ref[...] = (mask_sum * z + m_out + l_out).astype(out_ref.dtype)


def thrupling_forward(z, masks, m_params, l_params, *, block_b=512):
    """z: (B, D) f32, masks: (3, D) f32, params: (W1,b1,W2,b2,W3,b3) with W:(in,out), b:(1,out)."""
    B, D = z.shape
    H = m_params[0].shape[1]
    f32, bf16 = jnp.float32, jnp.bfloat16

    # Lane-dense padding of feature / hidden dims.
    Dp = max(_round_up(D, 128), 128)
    Hp = max(_round_up(H, 128), 128)

    # Batch tile: large tiles amortize per-grid-step overhead; sublane multiple of 8.
    TB = min(block_b, _round_up(B, 8))
    Bp = _round_up(B, TB)

    # Pad activations.
    z_p = jnp.zeros((Bp, Dp), f32).at[:B, :D].set(z.astype(f32))

    # Precompute the three mask rows the kernel needs (f32, no disjointness assumed).
    m0, m1, m2 = masks[0].astype(f32), masks[1].astype(f32), masks[2].astype(f32)
    masks_pre = jnp.zeros((3, Dp), f32)
    masks_pre = masks_pre.at[0, :D].set(m0)
    masks_pre = masks_pre.at[1, :D].set(m0 + m1)
    masks_pre = masks_pre.at[2, :D].set(m0 + m1 + m2)

    def pad_params(params, out_mask):
        w1, b1, w2, b2, w3, b3 = params
        w1p = jnp.zeros((Dp, Hp), f32).at[:D, :H].set(w1)
        b1p = jnp.zeros((1, Hp), f32).at[:, :H].set(b1.reshape(1, -1))
        w2p = jnp.zeros((Hp, Hp), f32).at[:H, :H].set(w2)
        b2p = jnp.zeros((1, Hp), f32).at[:, :H].set(b2.reshape(1, -1))
        # Fold the output mask into the last layer (scale output columns).
        w3f = w3 * out_mask[None, :]
        b3f = b3.reshape(1, -1) * out_mask[None, :]
        w3p = jnp.zeros((Hp, Dp), f32).at[:H, :D].set(w3f)
        b3p = jnp.zeros((1, Dp), f32).at[:, :D].set(b3f)
        # Weights bf16 for the MXU; biases stay f32 (added post-accumulation).
        return (w1p.astype(bf16), b1p, w2p.astype(bf16), b2p, w3p.astype(bf16), b3p)

    mp = pad_params(m_params, m1)
    lp = pad_params(l_params, m2)

    grid = (Bp // TB,)

    def const_spec(shape):
        return pl.BlockSpec(shape, lambda i: (0, 0))

    in_specs = (
        [const_spec((3, Dp))] +                                   # masks_pre (resident)
        [pl.BlockSpec((TB, Dp), lambda i: (i, 0))] +              # z tile
        [const_spec(p.shape) for p in mp] +                       # MLP_m params (resident)
        [const_spec(p.shape) for p in lp]                         # MLP_l params (resident)
    )
    out_spec = pl.BlockSpec((TB, Dp), lambda i: (i, 0))

    # Explicit VMEM budget: resident weights/masks + double-buffered z & out tiles + headroom.
    def nbytes(x):
        return int(x.size) * x.dtype.itemsize
    weight_bytes = sum(nbytes(p) for p in (*mp, *lp)) + nbytes(masks_pre)
    tile_bytes = 2 * 2 * TB * Dp * 4                              # 2 arrays x 2 buffers, f32
    vmem_limit = weight_bytes + tile_bytes + (8 << 20)            # generous headroom

    out_p = pl.pallas_call(
        thrupling_kernel,
        out_shape=jax.ShapeDtypeStruct((Bp, Dp), f32),
        grid=grid,
        in_specs=in_specs,
        out_specs=out_spec,
        compiler_params=pltpu.CompilerParams(
            dimension_semantics=("parallel",),   # megacore sharding on v7x; no-op on v5e/v6e
            vmem_limit_bytes=int(vmem_limit),
        ),
    )(masks_pre, z_p, *mp, *lp)

    return out_p[:B, :D].astype(z.dtype)


# ---------------------------------------------------------------------------
# Reference (pure f32, mirrors the PyTorch module) and demo.
# ---------------------------------------------------------------------------

def _init_mlp_params(key, input_dim, hidden_dim, output_dim):
    """Deterministic init; weights stored as (in, out), biases as (1, out)."""
    k1, k2, k3, k4, k5, k6 = jax.random.split(key, 6)
    scale = 0.1
    w1 = scale * jax.random.normal(k1, (input_dim, hidden_dim), jnp.float32)
    b1 = scale * jax.random.normal(k2, (1, hidden_dim), jnp.float32)
    w2 = scale * jax.random.normal(k3, (hidden_dim, hidden_dim), jnp.float32)
    b2 = scale * jax.random.normal(k4, (1, hidden_dim), jnp.float32)
    w3 = scale * jax.random.normal(k5, (hidden_dim, output_dim), jnp.float32)
    b3 = scale * jax.random.normal(k6, (1, output_dim), jnp.float32)
    return (w1, b1, w2, b2, w3, b3)


def _mlp_ref(x, params):
    w1, b1, w2, b2, w3, b3 = params
    h = _leaky_relu(x @ w1 + b1)
    h = _leaky_relu(h @ w2 + b2)
    return h @ w3 + b3


def _forward_ref(z, masks, m_params, l_params):
    z_a = masks[0:1] * z
    z_b = masks[1:2] * z
    z_c = masks[2:3] * z
    x_b = z_b + _mlp_ref(z_a, m_params) * masks[1:2]
    x_c = z_c + _mlp_ref(z_a + z_b, l_params) * masks[2:3]
    return z_a + x_b + x_c


if __name__ == "__main__":
    batch = 8
    input_dim = 16
    hidden_dim = 32
    output_dim = input_dim

    key = jax.random.PRNGKey(0)
    k_z, k_m, k_l = jax.random.split(key, 3)

    z = jax.random.normal(k_z, (batch, input_dim), jnp.float32)

    # Thrupling masks: partition the feature axis into three groups (the kernel does
    # NOT rely on them being a disjoint partition).
    d = jnp.arange(input_dim)
    masks = jnp.stack([
        (d % 3 == 0).astype(jnp.float32),
        (d % 3 == 1).astype(jnp.float32),
        (d % 3 == 2).astype(jnp.float32),
    ], axis=0)  # (3, D)

    m_params = _init_mlp_params(k_m, input_dim, hidden_dim, output_dim)
    l_params = _init_mlp_params(k_l, input_dim, hidden_dim, output_dim)

    fwd = jax.jit(functools.partial(thrupling_forward, block_b=512))
    out = fwd(z, masks, m_params, l_params)
    out = jax.block_until_ready(out)

    ref = _forward_ref(z, masks, m_params, l_params)
    # MXU operands are bf16 (f32 accumulation), so compare against the f32 reference
    # with a bf16-appropriate tolerance.
    assert jnp.allclose(out, ref, atol=2e-2, rtol=2e-2), "mismatch vs JAX reference"

    print("KERNEL_OK")
</pallas_src>

<mosaic_0001>
module attributes {stable_mosaic.version = 11 : i64} {
  func.func @thrupling_kernel(%arg0: i32, %arg1: memref<3x128xf32, #tpu.memory_space<vmem>>, %arg2: memref<8x128xf32, #tpu.memory_space<vmem>>, %arg3: memref<128x128xbf16, #tpu.memory_space<vmem>>, %arg4: memref<1x128xf32, #tpu.memory_space<vmem>>, %arg5: memref<128x128xbf16, #tpu.memory_space<vmem>>, %arg6: memref<1x128xf32, #tpu.memory_space<vmem>>, %arg7: memref<128x128xbf16, #tpu.memory_space<vmem>>, %arg8: memref<1x128xf32, #tpu.memory_space<vmem>>, %arg9: memref<128x128xbf16, #tpu.memory_space<vmem>>, %arg10: memref<1x128xf32, #tpu.memory_space<vmem>>, %arg11: memref<128x128xbf16, #tpu.memory_space<vmem>>, %arg12: memref<1x128xf32, #tpu.memory_space<vmem>>, %arg13: memref<128x128xbf16, #tpu.memory_space<vmem>>, %arg14: memref<1x128xf32, #tpu.memory_space<vmem>>, %arg15: memref<8x128xf32, #tpu.memory_space<vmem>>) attributes {dimension_semantics = [#tpu.dimension_semantics<parallel>], iteration_bounds = array<i64: 1>, scalar_prefetch = 0 : i64, scratch_operands = 0 : i64, tpu.core_type = #tpu.core_type<tc>, window_params = [{pipeline_mode = #tpu.pipeline_mode<synchronous>, transform_indices = @transform_0, window_bounds = array<i64: 3, 128>}, {transform_indices = @transform_1, window_bounds = array<i64: 8, 128>}, {pipeline_mode = #tpu.pipeline_mode<synchronous>, transform_indices = @transform_2, window_bounds = array<i64: 128, 128>}, {pipeline_mode = #tpu.pipeline_mode<synchronous>, transform_indices = @transform_3, window_bounds = array<i64: 1, 128>}, {pipeline_mode = #tpu.pipeline_mode<synchronous>, transform_indices = @transform_4, window_bounds = array<i64: 128, 128>}, {pipeline_mode = #tpu.pipeline_mode<synchronous>, transform_indices = @transform_5, window_bounds = array<i64: 1, 128>}, {pipeline_mode = #tpu.pipeline_mode<synchronous>, transform_indices = @transform_6, window_bounds = array<i64: 128, 128>}, {pipeline_mode = #tpu.pipeline_mode<synchronous>, transform_indices = @transform_7, window_bounds = array<i64: 1, 128>}, {pipeline_mode = #tpu.pipeline_mode<synchronous>, transform_indices = @transform_8, window_bounds = array<i64: 128, 128>}, {pipeline_mode = #tpu.pipeline_mode<synchronous>, transform_indices = @transform_9, window_bounds = array<i64: 1, 128>}, {pipeline_mode = #tpu.pipeline_mode<synchronous>, transform_indices = @transform_10, window_bounds = array<i64: 128, 128>}, {pipeline_mode = #tpu.pipeline_mode<synchronous>, transform_indices = @transform_11, window_bounds = array<i64: 1, 128>}, {pipeline_mode = #tpu.pipeline_mode<synchronous>, transform_indices = @transform_12, window_bounds = array<i64: 128, 128>}, {pipeline_mode = #tpu.pipeline_mode<synchronous>, transform_indices = @transform_13, window_bounds = array<i64: 1, 128>}, {transform_indices = @transform_14, window_bounds = array<i64: 8, 128>}]} {
    %c0 = arith.constant 0 : index
    %c0_0 = arith.constant 0 : index
    %0 = vector.load %arg2[%c0, %c0_0] : memref<8x128xf32, #tpu.memory_space<vmem>>, vector<8x128xf32>
    %c0_1 = arith.constant 0 : index
    %c0_2 = arith.constant 0 : index
    %1 = vector.load %arg1[%c0_1, %c0_2] : memref<3x128xf32, #tpu.memory_space<vmem>>, vector<1x128xf32>
    %c1 = arith.constant 1 : index
    %c0_3 = arith.constant 0 : index
    %2 = vector.load %arg1[%c1, %c0_3] : memref<3x128xf32, #tpu.memory_space<vmem>>, vector<1x128xf32>
    %c2 = arith.constant 2 : index
    %c0_4 = arith.constant 0 : index
    %3 = vector.load %arg1[%c2, %c0_4] : memref<3x128xf32, #tpu.memory_space<vmem>>, vector<1x128xf32>
    %4 = vector.broadcast %1 : vector<1x128xf32> to vector<8x128xf32>
    %5 = arith.mulf %4, %0 : vector<8x128xf32>
    %6 = arith.truncf %5 : vector<8x128xf32> to vector<8x128xbf16>
    %7 = vector.broadcast %2 : vector<1x128xf32> to vector<8x128xf32>
    %8 = arith.mulf %7, %0 : vector<8x128xf32>
    %9 = arith.truncf %8 : vector<8x128xf32> to vector<8x128xbf16>
    %c0_5 = arith.constant 0 : index
    %c0_6 = arith.constant 0 : index
    %10 = vector.load %arg3[%c0_5, %c0_6] : memref<128x128xbf16, #tpu.memory_space<vmem>>, vector<128x128xbf16>
    %cst = arith.constant dense<0.000000e+00> : vector<8x128xf32>
    %11 = tpu.matmul %6, %10, %cst {dimension_numbers = #tpu.dot_dimension_numbers<[1], [0], [0], [1], [0, 0, 1, 1], [], []>} : vector<8x128xbf16>, vector<128x128xbf16>, vector<8x128xf32> -> vector<8x128xf32>
    %c0_7 = arith.constant 0 : index
    %c0_8 = arith.constant 0 : index
    %12 = vector.load %arg4[%c0_7, %c0_8] : memref<1x128xf32, #tpu.memory_space<vmem>>, vector<1x128xf32>
    %13 = vector.broadcast %12 : vector<1x128xf32> to vector<8x128xf32>
    %14 = arith.addf %11, %13 : vector<8x128xf32>
    %c0_9 = arith.constant 0 : index
    %c0_10 = arith.constant 0 : index
    %15 = vector.load %arg9[%c0_9, %c0_10] : memref<128x128xbf16, #tpu.memory_space<vmem>>, vector<128x128xbf16>
    %cst_11 = arith.constant dense<0.000000e+00> : vector<8x128xf32>
    %16 = tpu.matmul %9, %15, %cst_11 {dimension_numbers = #tpu.dot_dimension_numbers<[1], [0], [0], [1], [0, 0, 1, 1], [], []>} : vector<8x128xbf16>, vector<128x128xbf16>, vector<8x128xf32> -> vector<8x128xf32>
    %c0_12 = arith.constant 0 : index
    %c0_13 = arith.constant 0 : index
    %17 = vector.load %arg10[%c0_12, %c0_13] : memref<1x128xf32, #tpu.memory_space<vmem>>, vector<1x128xf32>
    %18 = vector.broadcast %17 : vector<1x128xf32> to vector<8x128xf32>
    %19 = arith.addf %16, %18 : vector<8x128xf32>
    %cst_14 = arith.constant 0.000000e+00 : f32
    %20 = vector.broadcast %cst_14 : f32 to vector<8x128xf32>
    %21 = arith.cmpf ogt, %14, %20 : vector<8x128xf32>
    %cst_15 = arith.constant 2.000000e-01 : f32
    %22 = vector.broadcast %cst_15 : f32 to vector<8x128xf32>
    %23 = arith.mulf %22, %14 : vector<8x128xf32>
    %24 = arith.select %21, %14, %23 : vector<8x128xi1>, vector<8x128xf32>
    %25 = arith.truncf %24 : vector<8x128xf32> to vector<8x128xbf16>
    %cst_16 = arith.constant 0.000000e+00 : f32
    %26 = vector.broadcast %cst_16 : f32 to vector<8x128xf32>
    %27 = arith.cmpf ogt, %19, %26 : vector<8x128xf32>
    %cst_17 = arith.constant 2.000000e-01 : f32
    %28 = vector.broadcast %cst_17 : f32 to vector<8x128xf32>
    %29 = arith.mulf %28, %19 : vector<8x128xf32>
    %30 = arith.select %27, %19, %29 : vector<8x128xi1>, vector<8x128xf32>
    %31 = arith.truncf %30 : vector<8x128xf32> to vector<8x128xbf16>
    %c0_18 = arith.constant 0 : index
    %c0_19 = arith.constant 0 : index
    %32 = vector.load %arg5[%c0_18, %c0_19] : memref<128x128xbf16, #tpu.memory_space<vmem>>, vector<128x128xbf16>
    %cst_20 = arith.constant dense<0.000000e+00> : vector<8x128xf32>
    %33 = tpu.matmul %25, %32, %cst_20 {dimension_numbers = #tpu.dot_dimension_numbers<[1], [0], [0], [1], [0, 0, 1, 1], [], []>} : vector<8x128xbf16>, vector<128x128xbf16>, vector<8x128xf32> -> vector<8x128xf32>
    %c0_21 = arith.constant 0 : index
    %c0_22 = arith.constant 0 : index
    %34 = vector.load %arg6[%c0_21, %c0_22] : memref<1x128xf32, #tpu.memory_space<vmem>>, vector<1x128xf32>
    %35 = vector.broadcast %34 : vector<1x128xf32> to vector<8x128xf32>
    %36 = arith.addf %33, %35 : vector<8x128xf32>
    %c0_23 = arith.constant 0 : index
    %c0_24 = arith.constant 0 : index
    %37 = vector.load %arg11[%c0_23, %c0_24] : memref<128x128xbf16, #tpu.memory_space<vmem>>, vector<128x128xbf16>
    %cst_25 = arith.constant dense<0.000000e+00> : vector<8x128xf32>
    %38 = tpu.matmul %31, %37, %cst_25 {dimension_numbers = #tpu.dot_dimension_numbers<[1], [0], [0], [1], [0, 0, 1, 1], [], []>} : vector<8x128xbf16>, vector<128x128xbf16>, vector<8x128xf32> -> vector<8x128xf32>
    %c0_26 = arith.constant 0 : index
    %c0_27 = arith.constant 0 : index
    %39 = vector.load %arg12[%c0_26, %c0_27] : memref<1x128xf32, #tpu.memory_space<vmem>>, vector<1x128xf32>
    %40 = vector.broadcast %39 : vector<1x128xf32> to vector<8x128xf32>
    %41 = arith.addf %38, %40 : vector<8x128xf32>
    %cst_28 = arith.constant 0.000000e+00 : f32
    %42 = vector.broadcast %cst_28 : f32 to vector<8x128xf32>
    %43 = arith.cmpf ogt, %36, %42 : vector<8x128xf32>
    %cst_29 = arith.constant 2.000000e-01 : f32
    %44 = vector.broadcast %cst_29 : f32 to vector<8x128xf32>
    %45 = arith.mulf %44, %36 : vector<8x128xf32>
    %46 = arith.select %43, %36, %45 : vector<8x128xi1>, vector<8x128xf32>
    %47 = arith.truncf %46 : vector<8x128xf32> to vector<8x128xbf16>
    %cst_30 = arith.constant 0.000000e+00 : f32
    %48 = vector.broadcast %cst_30 : f32 to vector<8x128xf32>
    %49 = arith.cmpf ogt, %41, %48 : vector<8x128xf32>
    %cst_31 = arith.constant 2.000000e-01 : f32
    %50 = vector.broadcast %cst_31 : f32 to vector<8x128xf32>
    %51 = arith.mulf %50, %41 : vector<8x128xf32>
    %52 = arith.select %49, %41, %51 : vector<8x128xi1>, vector<8x128xf32>
    %53 = arith.truncf %52 : vector<8x128xf32> to vector<8x128xbf16>
    %c0_32 = arith.constant 0 : index
    %c0_33 = arith.constant 0 : index
    %54 = vector.load %arg7[%c0_32, %c0_33] : memref<128x128xbf16, #tpu.memory_space<vmem>>, vector<128x128xbf16>
    %cst_34 = arith.constant dense<0.000000e+00> : vector<8x128xf32>
    %55 = tpu.matmul %47, %54, %cst_34 {dimension_numbers = #tpu.dot_dimension_numbers<[1], [0], [0], [1], [0, 0, 1, 1], [], []>} : vector<8x128xbf16>, vector<128x128xbf16>, vector<8x128xf32> -> vector<8x128xf32>
    %c0_35 = arith.constant 0 : index
    %c0_36 = arith.constant 0 : index
    %56 = vector.load %arg8[%c0_35, %c0_36] : memref<1x128xf32, #tpu.memory_space<vmem>>, vector<1x128xf32>
    %57 = vector.broadcast %56 : vector<1x128xf32> to vector<8x128xf32>
    %58 = arith.addf %55, %57 : vector<8x128xf32>
    %c0_37 = arith.constant 0 : index
    %c0_38 = arith.constant 0 : index
    %59 = vector.load %arg13[%c0_37, %c0_38] : memref<128x128xbf16, #tpu.memory_space<vmem>>, vector<128x128xbf16>
    %cst_39 = arith.constant dense<0.000000e+00> : vector<8x128xf32>
    %60 = tpu.matmul %53, %59, %cst_39 {dimension_numbers = #tpu.dot_dimension_numbers<[1], [0], [0], [1], [0, 0, 1, 1], [], []>} : vector<8x128xbf16>, vector<128x128xbf16>, vector<8x128xf32> -> vector<8x128xf32>
    %c0_40 = arith.constant 0 : index
    %c0_41 = arith.constant 0 : index
    %61 = vector.load %arg14[%c0_40, %c0_41] : memref<1x128xf32, #tpu.memory_space<vmem>>, vector<1x128xf32>
    %62 = vector.broadcast %61 : vector<1x128xf32> to vector<8x128xf32>
    %63 = arith.addf %60, %62 : vector<8x128xf32>
    %64 = vector.broadcast %3 : vector<1x128xf32> to vector<8x128xf32>
    %65 = arith.mulf %64, %0 : vector<8x128xf32>
    %66 = arith.addf %65, %58 : vector<8x128xf32>
    %67 = arith.addf %66, %63 : vector<8x128xf32>
    %c0_42 = arith.constant 0 : index
    %c0_43 = arith.constant 0 : index
    %68 = vector.load %arg15[%c0_42, %c0_43] : memref<8x128xf32, #tpu.memory_space<vmem>>, vector<8x128xf32>
    tpu.vector_store %arg15[%c0_42, %c0_43], %67 {strides = array<i32>} : memref<8x128xf32, #tpu.memory_space<vmem>>, vector<8x128xf32>,
    return
  }
  func.func @transform_0(%arg0: i32) -> (i32, i32) {
    %c0_i32 = arith.constant 0 : i32
    %c0_i32_0 = arith.constant 0 : i32
    %c0_i32_1 = arith.constant 0 : i32
    return %c0_i32, %c0_i32_0 : i32, i32
  }
  func.func @transform_1(%arg0: i32) -> (i32, i32) {
    %c0_i32 = arith.constant 0 : i32
    %c0_i32_0 = arith.constant 0 : i32
    return %arg0, %c0_i32 : i32, i32
  }
  func.func @transform_2(%arg0: i32) -> (i32, i32) {
    %c0_i32 = arith.constant 0 : i32
    %c0_i32_0 = arith.constant 0 : i32
    %c0_i32_1 = arith.constant 0 : i32
    return %c0_i32, %c0_i32_0 : i32, i32
  }
  func.func @transform_3(%arg0: i32) -> (i32, i32) {
    %c0_i32 = arith.constant 0 : i32
    %c0_i32_0 = arith.constant 0 : i32
    %c0_i32_1 = arith.constant 0 : i32
    return %c0_i32, %c0_i32_0 : i32, i32
  }
  func.func @transform_4(%arg0: i32) -> (i32, i32) {
    %c0_i32 = arith.constant 0 : i32
    %c0_i32_0 = arith.constant 0 : i32
    %c0_i32_1 = arith.constant 0 : i32
    return %c0_i32, %c0_i32_0 : i32, i32
  }
  func.func @transform_5(%arg0: i32) -> (i32, i32) {
    %c0_i32 = arith.constant 0 : i32
    %c0_i32_0 = arith.constant 0 : i32
    %c0_i32_1 = arith.constant 0 : i32
    return %c0_i32, %c0_i32_0 : i32, i32
  }
  func.func @transform_6(%arg0: i32) -> (i32, i32) {
    %c0_i32 = arith.constant 0 : i32
    %c0_i32_0 = arith.constant 0 : i32
    %c0_i32_1 = arith.constant 0 : i32
    return %c0_i32, %c0_i32_0 : i32, i32
  }
  func.func @transform_7(%arg0: i32) -> (i32, i32) {
    %c0_i32 = arith.constant 0 : i32
    %c0_i32_0 = arith.constant 0 : i32
    %c0_i32_1 = arith.constant 0 : i32
    return %c0_i32, %c0_i32_0 : i32, i32
  }
  func.func @transform_8(%arg0: i32) -> (i32, i32) {
    %c0_i32 = arith.constant 0 : i32
    %c0_i32_0 = arith.constant 0 : i32
    %c0_i32_1 = arith.constant 0 : i32
    return %c0_i32, %c0_i32_0 : i32, i32
  }
  func.func @transform_9(%arg0: i32) -> (i32, i32) {
    %c0_i32 = arith.constant 0 : i32
    %c0_i32_0 = arith.constant 0 : i32
    %c0_i32_1 = arith.constant 0 : i32
    return %c0_i32, %c0_i32_0 : i32, i32
  }
  func.func @transform_10(%arg0: i32) -> (i32, i32) {
    %c0_i32 = arith.constant 0 : i32
    %c0_i32_0 = arith.constant 0 : i32
    %c0_i32_1 = arith.constant 0 : i32
    return %c0_i32, %c0_i32_0 : i32, i32
  }
  func.func @transform_11(%arg0: i32) -> (i32, i32) {
    %c0_i32 = arith.constant 0 : i32
    %c0_i32_0 = arith.constant 0 : i32
    %c0_i32_1 = arith.constant 0 : i32
    return %c0_i32, %c0_i32_0 : i32, i32
  }
  func.func @transform_12(%arg0: i32) -> (i32, i32) {
    %c0_i32 = arith.constant 0 : i32
    %c0_i32_0 = arith.constant 0 : i32
    %c0_i32_1 = arith.constant 0 : i32
    return %c0_i32, %c0_i32_0 : i32, i32
  }
  func.func @transform_13(%arg0: i32) -> (i32, i32) {
    %c0_i32 = arith.constant 0 : i32
    %c0_i32_0 = arith.constant 0 : i32
    %c0_i32_1 = arith.constant 0 : i32
    return %c0_i32, %c0_i32_0 : i32, i32
  }
  func.func @transform_14(%arg0: i32) -> (i32, i32) {
    %c0_i32 = arith.constant 0 : i32
    %c0_i32_0 = arith.constant 0 : i32
    return %arg0, %c0_i32 : i32, i32
  }
}

</mosaic_0001>

<bundles_post_ra>
// kernel: thrupling_forward.1
= control target key start
LH: loop header
LB: loop body
LE: loop exit
PB: predicated region body
PF: predicated region fallthrough
CT: control target
= control target key end

     0   :  { %s1115_s0 = inlined_call_operand.vmem [shape: f32[3,128], index: 0, kind: input, shape index: {}]   ;;  %s1116_s1 = inlined_call_operand.vmem [shape: f32[8,128], index: 1, kind: input, shape index: {}]   ;;  %s1117_s2 = inlined_call_operand.vmem [shape: bf16[128,128], index: 2, kind: input, shape index: {}]   ;;  %s1118_s3 = inlined_call_operand.vmem [shape: f32[1,128], index: 3, kind: input, shape index: {}]   ;;  %s1119_s4 = inlined_call_operand.vmem [shape: bf16[128,128], index: 4, kind: input, shape index: {}]   ;;  %s1120_s5 = inlined_call_operand.vmem [shape: f32[1,128], index: 5, kind: input, shape index: {}]   ;;  %s1121_s6 = inlined_call_operand.vmem [shape: bf16[128,128], index: 6, kind: input, shape index: {}]   ;;  %s1122_s7 = inlined_call_operand.vmem [shape: f32[1,128], index: 7, kind: input, shape index: {}]   ;;  %s1123_s8 = inlined_call_operand.vmem [shape: bf16[128,128], index: 8, kind: input, shape index: {}]   ;;  %s1124_s9 = inlined_call_operand.vmem [shape: f32[1,128], index: 9, kind: input, shape index: {}]   ;;  %s1125_s10 = inlined_call_operand.vmem [shape: bf16[128,128], index: 10, kind: input, shape index: {}]   ;;  %s1126_s11 = inlined_call_operand.vmem [shape: f32[1,128], index: 11, kind: input, shape index: {}]   ;;  %s1127_s12 = inlined_call_operand.vmem [shape: bf16[128,128], index: 12, kind: input, shape index: {}]   ;;  %s1128_s13 = inlined_call_operand.vmem [shape: f32[1,128], index: 13, kind: input, shape index: {}]   ;;  %s1129_s14 = inlined_call_operand.hbm [shape: f32[8,128], index: 14, kind: output, shape index: {}]  }
   0x1   :  { %v780_v0 = vld [vmem:[%s1117_s2 + $0x38] sm:$0xff]  ;;  %v779_v2 = vld [vmem:[%s1117_s2 + $0x30] sm:$0xff]  ;;  %v778_v4 = vld [vmem:[%s1117_s2 + $0x28] sm:$0xff] }
   0x2   :  { %v788_v1 = vld [vmem:[%s1123_s8 + $0x38] sm:$0xff]  ;;  %126 = vmatpush.bf16.msra.mxu0 %v780_v0  ;;  %v787_v3 = vld [vmem:[%s1123_s8 + $0x30] sm:$0xff]  ;;  %v786_v5 = vld [vmem:[%s1123_s8 + $0x28] sm:$0xff] }
   0x3   :  { %207 = vmatpush.bf16.msra.mxu1 %v788_v1  ;;  %v796_v6 = vld [vmem:[%s1119_s4 + $0x38] sm:$0xff]  ;;  %v795_v8 = vld [vmem:[%s1119_s4 + $0x30] sm:$0xff]  ;;  %v777_v10 = vld [vmem:[%s1117_s2 + $0x20] sm:$0xff] }
   0x4   :  { %v804_v7 = vld [vmem:[%s1125_s10 + $0x38] sm:$0xff]  ;;  %296 = vmatpush.bf16.msra.mxu2 %v796_v6  ;;  %v803_v9 = vld [vmem:[%s1125_s10 + $0x30] sm:$0xff]  ;;  %v785_v11 = vld [vmem:[%s1123_s8 + $0x20] sm:$0xff] }
   0x5   :  { %377 = vmatpush.bf16.msra.mxu3 %v804_v7  ;;  %v794_v12 = vld [vmem:[%s1119_s4 + $0x28] sm:$0xff] }
   0x6   :  { %127 = vmatpush.bf16.msra.mxu0 %v779_v2  ;;  %v802_v13 = vld [vmem:[%s1125_s10 + $0x28] sm:$0xff] }
   0x7   :  { %208 = vmatpush.bf16.msra.mxu1 %v787_v3 }
   0x8   :  { %297 = vmatpush.bf16.msra.mxu2 %v795_v8 }
   0x9   :  { %378 = vmatpush.bf16.msra.mxu3 %v803_v9 }
   0xa   :  { %128 = vmatpush.bf16.msra.mxu0 %v778_v4 }
   0xb   :  { %209 = vmatpush.bf16.msra.mxu1 %v786_v5 }
   0xc   :  { %19 = vsyncpa [#allocation3], 0  ;;  %v776_v14 = vld [vmem:[%s1117_s2 + $0x18] sm:$0xff]  ;;  %298 = vmatpush.bf16.msra.mxu2 %v794_v12  ;;  %v793_v16 = vld [vmem:[%s1119_s4 + $0x20] sm:$0xff]  ;;  %s857_s30 = smov [#allocation2]   ;;  %s572_s18 = sshll.u32 %s1129_s14, 4  ;;  %s573_s18 = int_to_ptr.hbm [resolvable:$true] %s572_s18 }
   0xd   :  { %v784_v15 = vld [vmem:[%s1123_s8 + $0x18] sm:$0xff]  ;;  %379 = vmatpush.bf16.msra.mxu3 %v802_v13  ;;  %v801_v17 = vld [vmem:[%s1125_s10 + $0x20] sm:$0xff]  ;;  %v775_v18 = vld [vmem:[%s1117_s2 + $0x10] sm:$0xff]  ;;  %s570_s15 = sshll.u32 %s857_s30, 4  ;;  %s571_s15 = int_to_ptr.vmem [resolvable:$true] %s570_s15 }
   0xe   :  { %129 = vmatpush.bf16.msra.mxu0 %v777_v10  ;;  %v783_v19 = vld [vmem:[%s1123_s8 + $0x10] sm:$0xff]  ;;  %v822_v20 = vld [vmem:[%s1115_s0] ss:$0 sm:$0xff]  ;;  %v823_v21 = vld [vmem:[%s1115_s0 + $0x1] ss:$0 sm:$0xff] }
   0xf   :  { %210 = vmatpush.bf16.msra.mxu1 %v785_v11  ;;  %v792_v22 = vld [vmem:[%s1119_s4 + $0x18] sm:$0xff]  ;;  %v774_v24 = vld [vmem:[%s1117_s2 + $0x8] sm:$0xff]  ;;  %v1014_v26 = vld [vmem:[%s1116_s1] sm:$0xff] }
  0x10   :  { %299 = vmatpush.bf16.msra.mxu2 %v793_v16  ;;  %v800_v23 = vld [vmem:[%s1125_s10 + $0x18] sm:$0xff]  ;;  %v782_v25 = vld [vmem:[%s1123_s8 + $0x8] sm:$0xff]  ;;  %v53_v27 = vmul.f32 %v822_v20, %v1014_v26  ;;  %v56_v28 = vmul.f32 %v823_v21, %v1014_v26  ;;  %v791_v29 = vld [vmem:[%s1119_s4 + $0x10] sm:$0xff] }
  0x11   :  { %380 = vmatpush.bf16.msra.mxu3 %v801_v17  ;;  %v799_v30 = vld [vmem:[%s1125_s10 + $0x10] sm:$0xff]  ;;  %v773_v31 = vld [vmem:[%s1117_s2] sm:$0xff]  ;;  %v790_v35 = vld [vmem:[%s1119_s4 + $0x8] sm:$0xff] }
  0x12   :  { %130 = vmatpush.bf16.msra.mxu0 %v776_v14  ;;  %v781_v32 = vld [vmem:[%s1123_s8] sm:$0xff]  ;;  %v54_v33 = vpack.c.bf16 %v53_v27, %v53_v27  ;;  %v57_v34 = vpack.c.bf16 %v56_v28, %v56_v28  ;;  %v798_v36 = vld [vmem:[%s1125_s10 + $0x8] sm:$0xff]  ;;  %v812_v39 = vld [vmem:[%s1121_s6 + $0x38] sm:$0xff] }
  0x13   :  { %211 = vmatpush.bf16.msra.mxu1 %v784_v15  ;;  %v789_v37 = vld [vmem:[%s1119_s4] sm:$0xff]  ;;  %v820_v40 = vld [vmem:[%s1127_s12 + $0x38] sm:$0xff]  ;;  %v811_v41 = vld [vmem:[%s1121_s6 + $0x30] sm:$0xff] }
  0x14   :  { %300 = vmatpush.bf16.msra.mxu2 %v792_v22  ;;  %v797_v38 = vld [vmem:[%s1125_s10] sm:$0xff]  ;;  %v819_v42 = vld [vmem:[%s1127_s12 + $0x30] sm:$0xff]  ;;  %v810_v43 = vld [vmem:[%s1121_s6 + $0x28] sm:$0xff] }
  0x15   :  { %381 = vmatpush.bf16.msra.mxu3 %v800_v23  ;;  %v818_v44 = vld [vmem:[%s1127_s12 + $0x28] sm:$0xff]  ;;  %v809_v45 = vld [vmem:[%s1121_s6 + $0x20] sm:$0xff]  ;;  %v808_v47 = vld [vmem:[%s1121_s6 + $0x18] sm:$0xff] }
  0x16   :  { %131 = vmatpush.bf16.msra.mxu0 %v775_v18  ;;  %v817_v46 = vld [vmem:[%s1127_s12 + $0x20] sm:$0xff]  ;;  %v816_v48 = vld [vmem:[%s1127_s12 + $0x18] sm:$0xff]  ;;  %v807_v49 = vld [vmem:[%s1121_s6 + $0x10] sm:$0xff] }
  0x17   :  { %212 = vmatpush.bf16.msra.mxu1 %v783_v19  ;;  %v815_v50 = vld [vmem:[%s1127_s12 + $0x10] sm:$0xff]  ;;  %v824_v51 = vld [vmem:[%s1118_s3] ss:$0 sm:$0xff]  ;;  %v806_v1 = vld [vmem:[%s1121_s6 + $0x8] sm:$0xff] }
  0x18   :  { %301 = vmatpush.bf16.msra.mxu2 %v791_v29  ;;  %v825_v52 = vld [vmem:[%s1124_s9] ss:$0 sm:$0xff]  ;;  %v814_v2 = vld [vmem:[%s1127_s12 + $0x8] sm:$0xff]  ;;  %v829_v19 = vld [vmem:[%s1115_s0 + $0x2] ss:$0 sm:$0xff] }
  0x19   :  { %382 = vmatpush.bf16.msra.mxu3 %v799_v30  ;;  %v805_v3 = vld [vmem:[%s1121_s6] sm:$0xff]  ;;  %v561_v21 = vmul.f32 %v829_v19, %v1014_v26 }
  0x1a   :  { %132 = vmatpush.bf16.msra.mxu0 %v774_v24  ;;  %v813_v4 = vld [vmem:[%s1127_s12] sm:$0xff] }
  0x1b   :  { %213 = vmatpush.bf16.msra.mxu1 %v782_v25  ;;  %v826_v5 = vld [vmem:[%s1120_s5] ss:$0 sm:$0xff] }
  0x1c   :  { %302 = vmatpush.bf16.msra.mxu2 %v790_v35  ;;  %v827_v6 = vld [vmem:[%s1126_s11] ss:$0 sm:$0xff] }
  0x1d   :  { %383 = vmatpush.bf16.msra.mxu3 %v798_v36  ;;  %v828_v20 = vld [vmem:[%s1122_s7] ss:$0 sm:$0xff] }
  0x1e   :  { %133 = vmatpush.bf16.msra.mxu0 %v773_v31  ;;  %v830_v22 = vld [vmem:[%s1128_s13] ss:$0 sm:$0xff] }
  0x1f   :  { %214 = vmatpush.bf16.msra.mxu1 %v781_v32 }
  0x20   :  { %303 = vmatpush.bf16.msra.mxu2 %v789_v37 }
  0x21   :  { %134 = vmatmul.bf16.vlgmr.msra.gmra.mxu0 %v54_v33  ;;  %384 = vmatpush.bf16.msra.mxu3 %v797_v38 }
  0x22   :  { %215 = vmatmul.bf16.vlgmr.msra.gmra.mxu1 %v57_v34  ;;  %466 = vmatpush.bf16.msrb.mxu0 %v812_v39 }
  0x23   :  { %547 = vmatpush.bf16.msrb.mxu1 %v820_v40 }
  0x26   :  { %467 = vmatpush.bf16.msrb.mxu0 %v811_v41 }
  0x27   :  { %548 = vmatpush.bf16.msrb.mxu1 %v819_v42 }
  0x2a   :  { %468 = vmatpush.bf16.msrb.mxu0 %v810_v43 }
  0x2b   :  { %549 = vmatpush.bf16.msrb.mxu1 %v818_v44 }
  0x2e   :  { %469 = vmatpush.bf16.msrb.mxu0 %v809_v45 }
  0x2f   :  { %550 = vmatpush.bf16.msrb.mxu1 %v817_v46 }
  0x32   :  { %470 = vmatpush.bf16.msrb.mxu0 %v808_v47 }
  0x33   :  { %551 = vmatpush.bf16.msrb.mxu1 %v816_v48 }
  0x36   :  { %471 = vmatpush.bf16.msrb.mxu0 %v807_v49 }
  0x37   :  { %552 = vmatpush.bf16.msrb.mxu1 %v815_v50 }
  0x3a   :  { %472 = vmatpush.bf16.msrb.mxu0 %v806_v1 }
  0x3b   :  { %553 = vmatpush.bf16.msrb.mxu1 %v814_v2 }
  0x3e   :  { %473 = vmatpush.bf16.msrb.mxu0 %v805_v3 }
  0x3f   :  { %554 = vmatpush.bf16.msrb.mxu1 %v813_v4 }
  0x9e   :  { %v135_v53 = vpop.f32.mrf.mxu0 }
  0x9f   :  { %v216_v54 = vpop.f32.mrf.mxu1  ;;  %v136_v55 = vadd.f32 %v824_v51, %v135_v53 }
  0xa0   :  { %v217_v56 = vadd.f32 %v825_v52, %v216_v54 }
  0xa1   :  { %v221_v57 = vmul.f32 0.2, %v136_v55  ;;  %vm220_vm0 = vcmp.gt.f32.partialorder %v136_v55, 0.0 }
  0xa2   :  { %v225_v58 = vmul.f32 0.2, %v217_v56  ;;  %vm224_vm1 = vcmp.gt.f32.partialorder %v217_v56, 0.0 }
  0xa3   :  { %v222_v59 = vsel %vm220_vm0, %v136_v55, %v221_v57 }
  0xa4   :  { %v226_v60 = vsel %vm224_vm1, %v217_v56, %v225_v58  ;;  %v223_v61 = vpack.c.bf16 %v222_v59, %v222_v59 }
  0xa5   :  { %v227_v62 = vpack.c.bf16 %v226_v60, %v226_v60 }
  0xa6   :  { %v137_v63 = vpop.f32.mrf.mxu0  ;;  %304 = vmatmul.bf16.vlgmr.msra.gmra.mxu2 %v223_v61 }
  0xa7   :  { %v218_v0 = vpop.f32.mrf.mxu1  ;;  %385 = vmatmul.bf16.vlgmr.msra.gmra.mxu3 %v227_v62 }
 0x129   :  { %v305_v7 = vpop.f32.mrf.mxu2 }
 0x12a   :  { %v386_v8 = vpop.f32.mrf.mxu3  ;;  %v306_v9 = vadd.f32 %v826_v5, %v305_v7 }
 0x12b   :  { %v387_v10 = vadd.f32 %v827_v6, %v386_v8 }
 0x12c   :  { %vm390_vm2 = vcmp.gt.f32.partialorder %v306_v9, 0.0  ;;  %v391_v11 = vmul.f32 0.2, %v306_v9 }
 0x12d   :  { %vm394_vm3 = vcmp.gt.f32.partialorder %v387_v10, 0.0  ;;  %v395_v12 = vmul.f32 0.2, %v387_v10 }
 0x12e   :  { %v392_v13 = vsel %vm390_vm2, %v306_v9, %v391_v11 }
 0x12f   :  { %v396_v14 = vsel %vm394_vm3, %v387_v10, %v395_v12  ;;  %v393_v15 = vpack.c.bf16 %v392_v13, %v392_v13 }
 0x130   :  { %v397_v16 = vpack.c.bf16 %v396_v14, %v396_v14 }
 0x131   :  { %v307_v17 = vpop.f32.mrf.mxu2  ;;  %474 = vmatmul.bf16.vlgmr.msrb.gmra.mxu0 %v393_v15 }
 0x132   :  { %v388_v18 = vpop.f32.mrf.mxu3  ;;  %555 = vmatmul.bf16.vlgmr.msrb.gmra.mxu1 %v397_v16 }
 0x1ae   :  { %v475_v23 = vpop.f32.mrf.mxu0 }
 0x1af   :  { %v556_v24 = vpop.f32.mrf.mxu1  ;;  %v476_v25 = vadd.f32 %v828_v20, %v475_v23 }
 0x1b0   :  { %v557_v28 = vadd.f32 %v830_v22, %v556_v24 }
 0x1b1   :  { %v562_v27 = vadd.f32 %v561_v21, %v476_v25 }
 0x1b3   :  { %v563_v29 = vadd.f32 %v562_v27, %v557_v28 }
 0x1b5   :  { %564 = vst [vmem:[#allocation2] sm:$0xff] %v563_v29 }
 0x1b6   :  { %v477_v26 = vpop.f32.mrf.mxu0  ;;  %575 = dma.vmem_to_hbm [thread:$0]  %s571_s15, 128, %s573_s18, [#allocation3]  }
 0x1b7   :  { %v558_v30 = vpop.f32.mrf.mxu1 }
 0x1b8   :  { %855 = dma.done.wait [#allocation3], 128  }
 0x1b9   :  { %856 = vsyncadd [#allocation3], 4294967168 }
 0x1ba   :  { %580 = vsyncpa [#allocation3], 1 }

</bundles_post_ra>
